<compile_context>
chip_gen: v5e
topology: v5e:2x2
jax: 0.10.0
libtpu: 0.0.40
codegen_flags: <defaults>
</compile_context>

<pallas_src>
import functools
import math

import jax
import jax.numpy as jnp
from jax.experimental import pallas as pl
from jax.experimental.pallas import tpu as pltpu

LANE = 128
SUBLANE = 8          # f32 sublane granularity; kernel I/O is always f32


def _cdiv(a, b):
    return -(-a // b)


def _round_up(a, b):
    return _cdiv(a, b) * b


def _block_row_mean(v, m):
    """Per-logical-row mean of packed `v` via the block-diagonal matrix `m`.

    Split v into a bf16-exact high part and a tiny residual so the MXU
    reduction is f32-accurate (~1e-6) regardless of how the default f32
    matmul rounds its inputs.  Both matmuls run on the otherwise-idle MXU.
    """
    v_hi = v.astype(jnp.bfloat16).astype(jnp.float32)
    v_lo = v - v_hi
    return (jnp.dot(v_hi, m, preferred_element_type=jnp.float32)
            + jnp.dot(v_lo, m, preferred_element_type=jnp.float32))


def ffn_packed_kernel(x_ref, w1_ref, b1_ref, w2_ref, b2_ref, g_ref, bta_ref,
                      m_ref, o_ref, *, matmul_dtype):
    # x_ref: (pt, 128) lane-dense packed rows; each 128-lane row holds
    # r = 128/F logical feature rows side by side.  All math stays packed.
    x = x_ref[...].astype(jnp.float32)
    m = m_ref[...]

    # Linear1 (+ Dropout: identity in eval) + ReLU.  Block-diagonal W1 keeps
    # the MXU tiles full (K=128, N=r*H); accumulate in f32.
    h = jnp.dot(x.astype(matmul_dtype), w1_ref[...],
                preferred_element_type=jnp.float32) + b1_ref[...]
    h = jnp.maximum(h, 0.0)

    # Linear2 + residual (residual uses the original f32 x).
    y = jnp.dot(h.astype(matmul_dtype), w2_ref[...],
                preferred_element_type=jnp.float32) + b2_ref[...]
    y = y + x

    # LayerNorm over each logical row (F contiguous lanes), eps matches the
    # PyTorch default 1e-5.  mean/var come from block-diagonal MXU reductions
    # so no cross-lane XLU reductions or unpack/repack relayouts are needed.
    mean = _block_row_mean(y, m)
    cent = y - mean
    var = _block_row_mean(cent * cent, m)
    out = cent * jax.lax.rsqrt(var + 1e-5) * g_ref[...] + bta_ref[...]
    o_ref[...] = out.astype(o_ref.dtype)


def ffn_xla(x, w1, b1, w2, b2, gamma, beta, *, matmul_dtype=jnp.float32):
    """Plain-XLA path: small-N fallback and test reference."""
    xf = x.astype(jnp.float32)
    h = jnp.dot(xf.astype(matmul_dtype), w1.astype(matmul_dtype),
                preferred_element_type=jnp.float32) + b1.astype(jnp.float32)
    h = jnp.maximum(h, 0.0)
    y = jnp.dot(h.astype(matmul_dtype), w2.astype(matmul_dtype),
                preferred_element_type=jnp.float32) + b2.astype(jnp.float32)
    y = y + xf
    mean = jnp.mean(y, axis=-1, keepdims=True)
    var = jnp.mean((y - mean) ** 2, axis=-1, keepdims=True)
    return ((y - mean) * jax.lax.rsqrt(var + 1e-5)
            * gamma.astype(jnp.float32) + beta.astype(jnp.float32))


def position_wise_ffn(x, w1, b1, w2, b2, gamma, beta, *,
                      row_tile=8192, matmul_dtype=jnp.bfloat16,
                      min_kernel_rows=128):
    """y = LayerNorm(Linear2(ReLU(Linear1(x))) + x).   x: (..., F) float32."""
    F = x.shape[-1]
    H = w1.shape[1]
    N = math.prod(x.shape[:-1])

    # Small inputs (launch overhead dominates) or feature sizes that don't
    # pack into 128 lanes go to plain XLA.
    # TODO(synk): packed kernel path for F that does not divide 128.
    if (N < min_kernel_rows) or (F > LANE) or (LANE % F != 0) \
            or ((N * F) % LANE != 0):
        return ffn_xla(x, w1, b1, w2, b2, gamma, beta,
                       matmul_dtype=matmul_dtype).astype(x.dtype)

    r = LANE // F                  # logical rows per packed 128-lane row
    P = (N * F) // LANE            # total packed rows
    rh = r * H                     # hidden width in packed layout

    # ---- packed-row tile size -------------------------------------------
    # Requested tile (logical rows -> packed rows, 8-sublane aligned).
    pt_req = max(SUBLANE, (row_tile * F // LANE) // SUBLANE * SUBLANE)
    # VMEM budget heuristic: ~12 live (pt,128) f32 temporaries + 3 live
    # (pt, r*H) f32 temporaries + double-buffered I/O; keep well under the
    # 32 MiB scoped VMEM we request below (v7x-safe).
    per_packed_row_bytes = 4 * (12 * LANE + 3 * rh)
    budget = 24 * 1024 * 1024
    pt_cap = max(SUBLANE, (budget // per_packed_row_bytes) // SUBLANE * SUBLANE)
    if P <= SUBLANE:
        pt = P                                   # single full-array block
    else:
        # Keep at least 2 grid steps so v7x's two TensorCores both get work.
        pt = min(pt_req, pt_cap, 4096, _round_up(_cdiv(P, 2), SUBLANE))
        pt = max(pt, SUBLANE)
    grid = _cdiv(P, pt)

    # ---- operand prep (all free or tiny; packed reshape is a bitcast) -----
    f32 = jnp.float32
    x_packed = x.astype(f32).reshape(P, LANE)
    eye_r = jnp.eye(r, dtype=f32)
    w1_bd = jnp.kron(eye_r, w1.astype(f32)).astype(matmul_dtype)   # (128, r*H)
    w2_bd = jnp.kron(eye_r, w2.astype(f32)).astype(matmul_dtype)   # (r*H, 128)
    m_red = jnp.kron(eye_r, jnp.full((F, F), 1.0 / F, f32))        # (128, 128)
    b1_t = jnp.tile(b1.astype(f32), r).reshape(1, rh)
    b2_t = jnp.tile(b2.astype(f32), r).reshape(1, LANE)
    g_t = jnp.tile(gamma.astype(f32), r).reshape(1, LANE)
    bt_t = jnp.tile(beta.astype(f32), r).reshape(1, LANE)

    kernel = functools.partial(ffn_packed_kernel, matmul_dtype=matmul_dtype)

    mm_bytes = jnp.dtype(matmul_dtype).itemsize
    cost = pl.CostEstimate(
        flops=int(4 * P * LANE * rh + 8 * P * LANE * LANE + 16 * P * LANE),
        transcendentals=int(P * LANE),
        bytes_accessed=int(2 * P * LANE * 4 + 2 * LANE * rh * mm_bytes
                           + LANE * LANE * 4 + (rh + 3 * LANE) * 4),
    )

    out_packed = pl.pallas_call(
        kernel,
        out_shape=jax.ShapeDtypeStruct((P, LANE), f32),
        grid=(grid,),
        in_specs=[
            pl.BlockSpec((pt, LANE), lambda i: (i, 0)),     # x (packed, streamed)
            pl.BlockSpec((LANE, rh), lambda i: (0, 0)),     # W1 block-diag (resident)
            pl.BlockSpec((1, rh), lambda i: (0, 0)),        # b1 (lane-tiled)
            pl.BlockSpec((rh, LANE), lambda i: (0, 0)),     # W2 block-diag (resident)
            pl.BlockSpec((1, LANE), lambda i: (0, 0)),      # b2 (lane-tiled)
            pl.BlockSpec((1, LANE), lambda i: (0, 0)),      # gamma (lane-tiled)
            pl.BlockSpec((1, LANE), lambda i: (0, 0)),      # beta (lane-tiled)
            pl.BlockSpec((LANE, LANE), lambda i: (0, 0)),   # LN reduction matrix
        ],
        out_specs=pl.BlockSpec((pt, LANE), lambda i: (i, 0)),
        compiler_params=pltpu.CompilerParams(
            dimension_semantics=("parallel",),
            vmem_limit_bytes=32 * 1024 * 1024,
        ),
        cost_estimate=cost,
    )(x_packed, w1_bd, b1_t, w2_bd, b2_t, g_t, bt_t, m_red)

    return out_packed.reshape(x.shape).astype(x.dtype)


if __name__ == "__main__":
    # Small shapes consistent with the module: feature_size=32, num_units=64.
    B, S, F, H = 2, 128, 32, 64

    key = jax.random.PRNGKey(0)
    kx, kw1, kb1, kw2, kb2 = jax.random.split(key, 5)

    x = jax.random.normal(kx, (B, S, F), dtype=jnp.float32)
    # init_weight(): uniform(-0.1, 0.1) for linear weights.
    w1 = jax.random.uniform(kw1, (F, H), jnp.float32, -0.1, 0.1)
    w2 = jax.random.uniform(kw2, (H, F), jnp.float32, -0.1, 0.1)
    b1 = jax.random.uniform(kb1, (H,), jnp.float32, -0.1, 0.1)
    b2 = jax.random.uniform(kb2, (F,), jnp.float32, -0.1, 0.1)
    # LayerNorm affine params (PyTorch default init).
    gamma = jnp.ones((F,), jnp.float32)
    beta = jnp.zeros((F,), jnp.float32)

    ref_bf16 = ffn_xla(x, w1, b1, w2, b2, gamma, beta, matmul_dtype=jnp.bfloat16)
    ref_f32 = ffn_xla(x, w1, b1, w2, b2, gamma, beta, matmul_dtype=jnp.float32)

    # Pallas kernel, default bf16 MXU fast path (f32 accumulation + f32 tail).
    out_bf16 = jax.block_until_ready(
        position_wise_ffn(x, w1, b1, w2, b2, gamma, beta))
    assert jnp.allclose(out_bf16, ref_bf16, atol=5e-4, rtol=5e-4), \
        "mismatch vs bf16-matmul reference"
    assert jnp.allclose(out_bf16, ref_f32, atol=5e-2, rtol=5e-2), \
        "bf16 path drifted too far from f32 module semantics"

    # Pallas kernel, full-f32 path matches the f32 module semantics tightly.
    out_f32 = jax.block_until_ready(
        position_wise_ffn(x, w1, b1, w2, b2, gamma, beta,
                          matmul_dtype=jnp.float32))
    assert jnp.allclose(out_f32, ref_f32, atol=5e-4, rtol=5e-4), \
        "mismatch vs f32 reference"

    # Tiny input exercises the small-N XLA fallback path.
    x_small = x[:, :8]
    out_small = jax.block_until_ready(
        position_wise_ffn(x_small, w1, b1, w2, b2, gamma, beta))
    ref_small = ffn_xla(x_small, w1, b1, w2, b2, gamma, beta,
                        matmul_dtype=jnp.bfloat16)
    assert jnp.allclose(out_small, ref_small, atol=5e-4, rtol=5e-4), \
        "mismatch on small-N fallback path"

    print("KERNEL_OK")
</pallas_src>

<mosaic_0001>
module attributes {stable_mosaic.version = 11 : i64} {
  func.func @ffn_packed_kernel(%arg0: i32, %arg1: memref<32x128xf32, #tpu.memory_space<vmem>>, %arg2: memref<128x256xbf16, #tpu.memory_space<vmem>>, %arg3: memref<1x256xf32, #tpu.memory_space<vmem>>, %arg4: memref<256x128xbf16, #tpu.memory_space<vmem>>, %arg5: memref<1x128xf32, #tpu.memory_space<vmem>>, %arg6: memref<1x128xf32, #tpu.memory_space<vmem>>, %arg7: memref<1x128xf32, #tpu.memory_space<vmem>>, %arg8: memref<128x128xf32, #tpu.memory_space<vmem>>, %arg9: memref<32x128xf32, #tpu.memory_space<vmem>>) attributes {dimension_semantics = [#tpu.dimension_semantics<parallel>], iteration_bounds = array<i64: 2>, scalar_prefetch = 0 : i64, scratch_operands = 0 : i64, tpu.core_type = #tpu.core_type<tc>, window_params = [{transform_indices = @transform_0, window_bounds = array<i64: 32, 128>}, {pipeline_mode = #tpu.pipeline_mode<synchronous>, transform_indices = @transform_1, window_bounds = array<i64: 128, 256>}, {pipeline_mode = #tpu.pipeline_mode<synchronous>, transform_indices = @transform_2, window_bounds = array<i64: 1, 256>}, {pipeline_mode = #tpu.pipeline_mode<synchronous>, transform_indices = @transform_3, window_bounds = array<i64: 256, 128>}, {pipeline_mode = #tpu.pipeline_mode<synchronous>, transform_indices = @transform_4, window_bounds = array<i64: 1, 128>}, {pipeline_mode = #tpu.pipeline_mode<synchronous>, transform_indices = @transform_5, window_bounds = array<i64: 1, 128>}, {pipeline_mode = #tpu.pipeline_mode<synchronous>, transform_indices = @transform_6, window_bounds = array<i64: 1, 128>}, {pipeline_mode = #tpu.pipeline_mode<synchronous>, transform_indices = @transform_7, window_bounds = array<i64: 128, 128>}, {transform_indices = @transform_8, window_bounds = array<i64: 32, 128>}]} {
    %c0 = arith.constant 0 : index
    %c0_0 = arith.constant 0 : index
    %0 = vector.load %arg1[%c0, %c0_0] : memref<32x128xf32, #tpu.memory_space<vmem>>, vector<32x128xf32>
    %c0_1 = arith.constant 0 : index
    %c0_2 = arith.constant 0 : index
    %1 = vector.load %arg8[%c0_1, %c0_2] : memref<128x128xf32, #tpu.memory_space<vmem>>, vector<128x128xf32>
    %2 = arith.truncf %0 : vector<32x128xf32> to vector<32x128xbf16>
    %c0_3 = arith.constant 0 : index
    %c0_4 = arith.constant 0 : index
    %3 = vector.load %arg2[%c0_3, %c0_4] : memref<128x256xbf16, #tpu.memory_space<vmem>>, vector<128x256xbf16>
    %cst = arith.constant dense<0.000000e+00> : vector<32x256xf32>
    %4 = tpu.matmul %2, %3, %cst {dimension_numbers = #tpu.dot_dimension_numbers<[1], [0], [0], [1], [0, 0, 1, 1], [], []>} : vector<32x128xbf16>, vector<128x256xbf16>, vector<32x256xf32> -> vector<32x256xf32>
    %c0_5 = arith.constant 0 : index
    %c0_6 = arith.constant 0 : index
    %5 = vector.load %arg3[%c0_5, %c0_6] : memref<1x256xf32, #tpu.memory_space<vmem>>, vector<1x256xf32>
    %6 = vector.broadcast %5 : vector<1x256xf32> to vector<32x256xf32>
    %7 = arith.addf %4, %6 : vector<32x256xf32>
    %cst_7 = arith.constant 0.000000e+00 : f32
    %8 = vector.broadcast %cst_7 : f32 to vector<32x256xf32>
    %9 = arith.maximumf %7, %8 : vector<32x256xf32>
    %10 = arith.truncf %9 : vector<32x256xf32> to vector<32x256xbf16>
    %c0_8 = arith.constant 0 : index
    %c0_9 = arith.constant 0 : index
    %11 = vector.load %arg4[%c0_8, %c0_9] : memref<256x128xbf16, #tpu.memory_space<vmem>>, vector<256x128xbf16>
    %cst_10 = arith.constant dense<0.000000e+00> : vector<32x128xf32>
    %12 = tpu.matmul %10, %11, %cst_10 {dimension_numbers = #tpu.dot_dimension_numbers<[1], [0], [0], [1], [0, 0, 1, 1], [], []>} : vector<32x256xbf16>, vector<256x128xbf16>, vector<32x128xf32> -> vector<32x128xf32>
    %c0_11 = arith.constant 0 : index
    %c0_12 = arith.constant 0 : index
    %13 = vector.load %arg5[%c0_11, %c0_12] : memref<1x128xf32, #tpu.memory_space<vmem>>, vector<1x128xf32>
    %14 = vector.broadcast %13 : vector<1x128xf32> to vector<32x128xf32>
    %15 = arith.addf %12, %14 : vector<32x128xf32>
    %16 = arith.addf %15, %0 : vector<32x128xf32>
    %17 = arith.truncf %16 : vector<32x128xf32> to vector<32x128xbf16>
    %18 = arith.extf %17 : vector<32x128xbf16> to vector<32x128xf32>
    %19 = arith.subf %16, %18 : vector<32x128xf32>
    %cst_13 = arith.constant dense<0.000000e+00> : vector<32x128xf32>
    %20 = tpu.matmul %18, %1, %cst_13 {dimension_numbers = #tpu.dot_dimension_numbers<[1], [0], [0], [1], [0, 0, 1, 1], [], []>} : vector<32x128xf32>, vector<128x128xf32>, vector<32x128xf32> -> vector<32x128xf32>
    %cst_14 = arith.constant dense<0.000000e+00> : vector<32x128xf32>
    %21 = tpu.matmul %19, %1, %cst_14 {dimension_numbers = #tpu.dot_dimension_numbers<[1], [0], [0], [1], [0, 0, 1, 1], [], []>} : vector<32x128xf32>, vector<128x128xf32>, vector<32x128xf32> -> vector<32x128xf32>
    %22 = arith.addf %20, %21 : vector<32x128xf32>
    %23 = arith.subf %16, %22 : vector<32x128xf32>
    %24 = arith.mulf %23, %23 : vector<32x128xf32>
    %25 = arith.truncf %24 : vector<32x128xf32> to vector<32x128xbf16>
    %26 = arith.extf %25 : vector<32x128xbf16> to vector<32x128xf32>
    %27 = arith.subf %24, %26 : vector<32x128xf32>
    %cst_15 = arith.constant dense<0.000000e+00> : vector<32x128xf32>
    %28 = tpu.matmul %26, %1, %cst_15 {dimension_numbers = #tpu.dot_dimension_numbers<[1], [0], [0], [1], [0, 0, 1, 1], [], []>} : vector<32x128xf32>, vector<128x128xf32>, vector<32x128xf32> -> vector<32x128xf32>
    %cst_16 = arith.constant dense<0.000000e+00> : vector<32x128xf32>
    %29 = tpu.matmul %27, %1, %cst_16 {dimension_numbers = #tpu.dot_dimension_numbers<[1], [0], [0], [1], [0, 0, 1, 1], [], []>} : vector<32x128xf32>, vector<128x128xf32>, vector<32x128xf32> -> vector<32x128xf32>
    %30 = arith.addf %28, %29 : vector<32x128xf32>
    %cst_17 = arith.constant 9.99999974E-6 : f32
    %31 = vector.broadcast %cst_17 : f32 to vector<32x128xf32>
    %32 = arith.addf %30, %31 : vector<32x128xf32>
    %33 = math.rsqrt %32 : vector<32x128xf32>
    %34 = arith.mulf %23, %33 : vector<32x128xf32>
    %c0_18 = arith.constant 0 : index
    %c0_19 = arith.constant 0 : index
    %35 = vector.load %arg6[%c0_18, %c0_19] : memref<1x128xf32, #tpu.memory_space<vmem>>, vector<1x128xf32>
    %36 = vector.broadcast %35 : vector<1x128xf32> to vector<32x128xf32>
    %37 = arith.mulf %34, %36 : vector<32x128xf32>
    %c0_20 = arith.constant 0 : index
    %c0_21 = arith.constant 0 : index
    %38 = vector.load %arg7[%c0_20, %c0_21] : memref<1x128xf32, #tpu.memory_space<vmem>>, vector<1x128xf32>
    %39 = vector.broadcast %38 : vector<1x128xf32> to vector<32x128xf32>
    %40 = arith.addf %37, %39 : vector<32x128xf32>
    %c0_22 = arith.constant 0 : index
    %c0_23 = arith.constant 0 : index
    %41 = vector.load %arg9[%c0_22, %c0_23] : memref<32x128xf32, #tpu.memory_space<vmem>>, vector<32x128xf32>
    tpu.vector_store %arg9[%c0_22, %c0_23], %40 {strides = array<i32>} : memref<32x128xf32, #tpu.memory_space<vmem>>, vector<32x128xf32>,
    return
  }
  func.func @transform_0(%arg0: i32) -> (i32, i32) {
    %c0_i32 = arith.constant 0 : i32
    %c0_i32_0 = arith.constant 0 : i32
    return %arg0, %c0_i32 : i32, i32
  }
  func.func @transform_1(%arg0: i32) -> (i32, i32) {
    %c0_i32 = arith.constant 0 : i32
    %c0_i32_0 = arith.constant 0 : i32
    %c0_i32_1 = arith.constant 0 : i32
    return %c0_i32, %c0_i32_0 : i32, i32
  }
  func.func @transform_2(%arg0: i32) -> (i32, i32) {
    %c0_i32 = arith.constant 0 : i32
    %c0_i32_0 = arith.constant 0 : i32
    %c0_i32_1 = arith.constant 0 : i32
    return %c0_i32, %c0_i32_0 : i32, i32
  }
  func.func @transform_3(%arg0: i32) -> (i32, i32) {
    %c0_i32 = arith.constant 0 : i32
    %c0_i32_0 = arith.constant 0 : i32
    %c0_i32_1 = arith.constant 0 : i32
    return %c0_i32, %c0_i32_0 : i32, i32
  }
  func.func @transform_4(%arg0: i32) -> (i32, i32) {
    %c0_i32 = arith.constant 0 : i32
    %c0_i32_0 = arith.constant 0 : i32
    %c0_i32_1 = arith.constant 0 : i32
    return %c0_i32, %c0_i32_0 : i32, i32
  }
  func.func @transform_5(%arg0: i32) -> (i32, i32) {
    %c0_i32 = arith.constant 0 : i32
    %c0_i32_0 = arith.constant 0 : i32
    %c0_i32_1 = arith.constant 0 : i32
    return %c0_i32, %c0_i32_0 : i32, i32
  }
  func.func @transform_6(%arg0: i32) -> (i32, i32) {
    %c0_i32 = arith.constant 0 : i32
    %c0_i32_0 = arith.constant 0 : i32
    %c0_i32_1 = arith.constant 0 : i32
    return %c0_i32, %c0_i32_0 : i32, i32
  }
  func.func @transform_7(%arg0: i32) -> (i32, i32) {
    %c0_i32 = arith.constant 0 : i32
    %c0_i32_0 = arith.constant 0 : i32
    %c0_i32_1 = arith.constant 0 : i32
    return %c0_i32, %c0_i32_0 : i32, i32
  }
  func.func @transform_8(%arg0: i32) -> (i32, i32) {
    %c0_i32 = arith.constant 0 : i32
    %c0_i32_0 = arith.constant 0 : i32
    return %arg0, %c0_i32 : i32, i32
  }
}

</mosaic_0001>

<bundles_post_ra>
// kernel: tpu_custom_call.1
= control target key start
LH: loop header
LB: loop body
LE: loop exit
PB: predicated region body
PF: predicated region fallthrough
CT: control target
= control target key end

     0   :  { %s1898_s0 = inlined_call_operand.hbm [shape: f32[64,128], index: 0, kind: input, shape index: {}]   ;;  %s1899_s1 = inlined_call_operand.hbm [shape: bf16[128,256], index: 1, kind: input, shape index: {}]   ;;  %s1900_s2 = inlined_call_operand.hbm [shape: f32[1,256], index: 2, kind: input, shape index: {}]   ;;  %s1901_s3 = inlined_call_operand.hbm [shape: bf16[256,128], index: 3, kind: input, shape index: {}]   ;;  %s1902_s4 = inlined_call_operand.vmem [shape: f32[1,128], index: 4, kind: input, shape index: {}]   ;;  %s1903_s5 = inlined_call_operand.vmem [shape: f32[1,128], index: 5, kind: input, shape index: {}]   ;;  %s1904_s6 = inlined_call_operand.vmem [shape: f32[1,128], index: 6, kind: input, shape index: {}]   ;;  %s1905_s7 = inlined_call_operand.hbm [shape: f32[128,128], index: 7, kind: input, shape index: {}]   ;;  %s1906_s8 = inlined_call_operand.hbm [shape: f32[64,128], index: 8, kind: output, shape index: {}]  }
   0x1   :  { %1910 = sst [smem:[#allocation16_spill]] %s1899_s1 }
   0x2   :  { %1911 = sst [smem:[#allocation17_spill]] %s1900_s2 }
   0x3   :  { %1912 = sst [smem:[#allocation18_spill]] %s1901_s3 }
   0x4   :  { %13 = vsyncpa [#allocation3], 0 }
   0x5   :  { %15 = vsyncpa [#allocation3 + $0x1], 0 }
   0x6   :  { %16 = vsyncpa [#allocation6], 0 }
   0x7   :  { %17 = vsyncpa [#allocation9], 0 }
   0x8   :  { %18 = vsyncpa [#allocation4], 0 }
   0x9   :  { %20 = vsyncpa [#allocation4 + $0x1], 0  ;;  %s1652_s27 = smov 0   ;;  %s1654_s28 = smov 0  }
   0xa   :  { %s1656_s29 = smov 0   ;;  %s1658_s30 = smov 0  }
   0xb LB: > { %s1673_s9 = sadd.s32 4294967295, %s1595_s30   ;;  %s1083_s10 = sadd.s32 4294967294, %s1595_s30   ;;  %s1595_s30 = sphi %s1658_s30, %s1928_s30   ;;  %s1591_s29 = sphi %s1656_s29, %s1927_s29   ;;  %s1587_s28 = sphi %s1654_s28, %s1926_s28   ;;  %s1583_s27 = sphi %s1652_s27, %s1925_s27  }
   0xc   : > { %p46_p0 = scmp.ne.s32.totalorder %s1587_s28, %s1583_s27  ;;  %p47_p1 = scmp.eq.s32.totalorder %s1673_s9, 0 }
   0xd   : > { %p217_p2 = scmp.eq.s32.totalorder %s1673_s9, 1  ;;  %p223_p3 = scmp.eq.s32.totalorder %s1083_s10, 1 }
   0xe   : > { %p1682_p4 = por %p47_p1, %p46_p0  ;;  %p1084_p5 = scmp.ge.s32.totalorder %s1595_s30, 1 }
   0xf   : > { %p1687_p6 = por %p223_p3, %p46_p0  ;;  %p230_p7 = scmp.lt.s32.totalorder %s1595_s30, 3 }
  0x10   : > { %s1915_s1 = sld [smem:[#allocation16_spill]]  ;;  %s1597_s17 = smov [#allocation5]  }
  0x11   : > { %p1695_p8 = pnand %p1084_p5, %p230_p7  ;;  %s243_s18 = sshll.u32 %s1597_s17, 4  ;;  %s244_s18 = int_to_ptr.vmem [resolvable:$true] %s243_s18 }
  0x12   : > { %s1918_s3 = sld [smem:[#allocation18_spill]]  ;;  %s1907_s23 = smov 128  }
  0x13   : > { %p1287_p9 = pneg %p1695_p8  ;;  %s1909_s24 = smov 8  }
  0x14   : > { %s1600_s25 = smov [#allocation8]   ;;  %s1601_s10 = smov 64  }
  0x15   : > { %p1703_p10 = pnand %p1287_p9, %p47_p1  ;;  %s269_s26 = sshll.u32 %s1600_s25, 4  ;;  %s270_s26 = int_to_ptr.vmem [resolvable:$true] %s269_s26 }
  0x16   : > { %s241_s15 = sshll.u32 %s1915_s1, 4  ;;  %s1602_s13 = smov 4   ;;  %s242_s15 = int_to_ptr.hbm [resolvable:$true] %s241_s15 }
  0x17   : > { %1290 = dma.hbm_to_vmem [thread:$0]  (!%p1703_p10), %s242_s15, 2048, %s244_s18, [#allocation6], %s1907_s23, %s1907_s23, %s1909_s24  }
  0x18   : > { %s267_s22 = sshll.u32 %s1918_s3, 4  ;;  %s1919_s2 = sld [smem:[#allocation17_spill]]  ;;  %s268_s22 = int_to_ptr.hbm [resolvable:$true] %s267_s22 }
  0x19   : > { %1296 = dma.hbm_to_vmem [thread:$0]  (!%p1703_p10), %s268_s22, 2048, %s270_s26, [#allocation9], %s1601_s10, %s1601_s10, %s1602_s13  }
  0x1a   : > { %s1603_s15 = smov [#allocation7]   ;;  %s290_s23 = sshll.u32 %s1905_s7, 4  ;;  %s291_s23 = int_to_ptr.hbm [resolvable:$true] %s290_s23 }
  0x1b   : > { %s258_s18 = sshll.u32 %s1603_s15, 4  ;;  %s1604_s22 = smov [#allocation10]   ;;  %s259_s18 = int_to_ptr.vmem [resolvable:$true] %s258_s18 }
  0x1c   : > { %s292_s26 = sshll.u32 %s1604_s22, 4  ;;  %s1920_s10 = smov 128   ;;  %s293_s26 = int_to_ptr.vmem [resolvable:$true] %s292_s26 }
  0x1d   : > { %1299 = dma.hbm_to_vmem [thread:$0]  (!%p1703_p10), %s291_s23, 2048, %s293_s26, [#allocation9], %s1920_s10, %s1920_s10, %s1909_s24  }
  0x1e   : > { %s256_s20 = sshll.u32 %s1919_s2, 4  ;;  %s1732_s13 = sadd.s32 1, %s1595_s30   ;;  %s257_s20 = int_to_ptr.hbm [resolvable:$true] %s256_s20 }
  0x1f   : > { %1293 = dma.hbm_to_vmem [thread:$0]  (!%p1703_p10), %s257_s20, 32, %s259_s18, [#allocation6]  }
  0x20   : > { %s33_s14 = sadd.s32 1, %s1591_s29  ;;  %s30_s17 = ssub.s32 %s1595_s30, %s1732_s13 }
  0x21   : > { %p40_p12 = scmp.ne.s32.totalorder %s1591_s29, %s1587_s28  ;;  %p31_p13 = scmp.eq.s32.totalorder %s30_s17, 0 }
  0x22   : > { %p41_p0 = scmp.eq.s32.totalorder %s1595_s30, 0  ;;  %p1312_p5 = scmp.lt.s32.totalorder %s1595_s30, 2 }
  0x23   : > { %p1742_p3 = por %p217_p2, %p40_p12  ;;  %s306_s19 = sand.u32 1, %s1591_s29  }
  0x24   : > { %s1748_s15 = scalar_select %p31_p13, %s1591_s29, %s33_s14  }
  0x25   : > { %p42_p7 = por %p41_p0, %p40_p12  ;;  %s1090_s18 = sshll.u32 %s306_s19, 5 }
  0x26   : > { %s1233_s23 = sshll.u32 %s1595_s30, 5  ;;  %s310_s26 = scalar_lea.vmem [#allocation2], %s1090_s18 }
  0x27   : > { %s315_s22 = scalar_lea.hbm %s1898_s0, %s1233_s23  ;;  %s318_s24 = sshll.u32 %s310_s26, 4  ;;  %s319_s24 = int_to_ptr.vmem [resolvable:$true] %s318_s24 }
  0x28   : > { %s316_s17 = sshll.u32 %s315_s22, 4  ;;  %p1755_p2 = pnand %p1312_p5, %p42_p7  ;;  %s317_s17 = int_to_ptr.hbm [resolvable:$true] %s316_s17 }
  0x29   : > { %s307_s14 = scalar_lea.sflag [#allocation3], %s306_s19  ;;  %s1491_s2 = sshra.s32 %s317_s17, 4  ;;  %s1492_s2 = int_to_ptr.hbm [resolvable:$true] %s1491_s2 }
  0x2a   : > { %s1493_s3 = scalar_lea.hbm %s1492_s2, 32  ;;  %p1495_p10 = pneg %p1755_p2 }
  0x2b   : > { %p1494_p9 = scmp.ne.s32.totalorder %s1492_s2, %s1493_s3  ;;  %s1498_s21 = scalar_lea.hbm %s1898_s0, 64 }
  0x2c   : > { %p1499_p0 = scmp.lt.s32.totalorder %s1492_s2, %s1898_s0  ;;  %p1500_p5 = scmp.lt.s32.totalorder %s1498_s21, %s1493_s3 }
  0x2d   : > { %p1496_p12 = pnand %p1495_p10, %p1494_p9 }
  0x2e   : > { %p1501_p7 = por %p1500_p5, %p1499_p0 }
  0x2f   : > { %p1497_p13 = pneg %p1496_p12 }
  0x31   : > { %p1502_p11 = pnand %p1501_p7, %p1497_p13 }
  0x33   : > { %1505 = shalt.err (!%p1502_p11)
}
  0x34   : > { %s1923_s19 = smov 8   ;;  %330 = sbr.rel (%p1695_p8) target bundleno = 706 (0x2c2), region = 52 }
  0x35   : > { %1303 = dma.hbm_to_vmem [thread:$0]  (!%p1755_p2), %s317_s17, 512, %s319_s24, %s307_s14, %s1920_s10, %s1920_s10, %s1923_s19  }
  0x36   : > { %s1775_s26 = sand.u32 (!%p1695_p8), 1, %s1587_s28  }
  0x37   : > { %s1094_s2 = sshll.u32 (!%p1695_p8), %s1775_s26, 5  ;;  %s333_s3 = scalar_lea.sflag (!%p1695_p8), [#allocation3], %s1775_s26 }
  0x38   : > { %s1781_s23 = scalar_lea.vmem (!%p1695_p8), [#allocation2], %s1094_s2 }
  0x39   : > { %1566 = dma.done.wait (%p1682_p4), %s333_s3, 512  }
  0x3a   : > { %1568 = vsyncadd (%p1682_p4), %s333_s3, 4294966784 }
  0x3b   : > { %1570 = dma.done.wait (%p47_p1), [#allocation6], 2080  }
  0x3c   : > { %1572 = vsyncadd (%p47_p1), [#allocation6], 4294965216 }
  0x3d   : > { %1574 = dma.done.wait (%p47_p1), [#allocation9], 4096  }
  0x3e   : > { %1576 = vsyncadd (%p47_p1), [#allocation9], 4294963200  ;;  %v1158_v0 = vld [vmem:[#allocation5 + $0x70] sm:$0xf]  ;;  %v1249_v1 = vld [vmem:[#allocation5 + $0x74] sm:$0xf0] }
  0x3f   : > { %v1248_v2 = vld [vmem:[#allocation5 + $0x74] sm:$0xf]  ;;  %v1159_v3 = vor.u32 %v1249_v1, %v1158_v0  ;;  %v1160_v4 = vld [vmem:[#allocation5 + $0x78] sm:$0xf0]  ;;  %v1150_v5 = vld [vmem:[#allocation5 + $0x60] sm:$0xf] }
  0x40   : > { %v1247_v6 = vld [vmem:[#allocation5 + $0x64] sm:$0xf0]  ;;  %v1163_v7 = vor.u32 %v1248_v2, %v1160_v4  ;;  %v1246_v8 = vld [vmem:[#allocation5 + $0x64] sm:$0xf]  ;;  %v1152_v9 = vld [vmem:[#allocation5 + $0x68] sm:$0xf0] }
  0x41   : > { %516 = vmatpush.bf16.msra.mxu0 %v1159_v3  ;;  %v1151_v10 = vor.u32 %v1247_v6, %v1150_v5  ;;  %v1155_v11 = vor.u32 %v1246_v8, %v1152_v9  ;;  %v1142_v12 = vld [vmem:[#allocation5 + $0x50] sm:$0xf]  ;;  %v1245_v13 = vld [vmem:[#allocation5 + $0x54] sm:$0xf0]  ;;  %v1244_v14 = vld [vmem:[#allocation5 + $0x54] sm:$0xf] }
  0x42   : > { %535 = vmatpush.bf16.msra.mxu1 %v1163_v7  ;;  %v1144_v15 = vld [vmem:[#allocation5 + $0x58] sm:$0xf0]  ;;  %v1143_v16 = vor.u32 %v1245_v13, %v1142_v12  ;;  %v1134_v18 = vld [vmem:[#allocation5 + $0x40] sm:$0xf]  ;;  %v1243_v19 = vld [vmem:[#allocation5 + $0x44] sm:$0xf0] }
  0x43   : > { %v1147_v17 = vor.u32 %v1244_v14, %v1144_v15  ;;  %v1242_v20 = vld [vmem:[#allocation5 + $0x44] sm:$0xf]  ;;  %v1136_v21 = vld [vmem:[#allocation5 + $0x48] sm:$0xf0]  ;;  %v1135_v22 = vor.u32 %v1243_v19, %v1134_v18  ;;  %v1126_v23 = vld [vmem:[#allocation5 + $0x30] sm:$0xf] }
  0x44   : > { %v1241_v24 = vld [vmem:[#allocation5 + $0x34] sm:$0xf0]  ;;  %v1139_v25 = vor.u32 %v1242_v20, %v1136_v21  ;;  %v1240_v26 = vld [vmem:[#allocation5 + $0x34] sm:$0xf]  ;;  %v1128_v27 = vld [vmem:[#allocation5 + $0x38] sm:$0xf0] }
  0x45   : > { %517 = vmatpush.bf16.msra.mxu0 %v1151_v10  ;;  %v1127_v28 = vor.u32 %v1241_v24, %v1126_v23  ;;  %v1131_v29 = vor.u32 %v1240_v26, %v1128_v27  ;;  %v1118_v30 = vld [vmem:[#allocation5 + $0x20] sm:$0xf]  ;;  %v1239_v31 = vld [vmem:[#allocation5 + $0x24] sm:$0xf0]  ;;  %v1238_v32 = vld [vmem:[#allocation5 + $0x24] sm:$0xf] }
  0x46   : > { %536 = vmatpush.bf16.msra.mxu1 %v1155_v11  ;;  %v1120_v33 = vld [vmem:[#allocation5 + $0x28] sm:$0xf0]  ;;  %v1119_v34 = vor.u32 %v1239_v31, %v1118_v30  ;;  %v1257_v35 = vld [vmem:[#allocation8 + $0x38] sm:$0xff]  ;;  %v1110_v38 = vld [vmem:[#allocation5 + $0x10] sm:$0xf]  ;;  %s1855_s14 = scalar_lea.vmem [#allocation11], %s1094_s2 }
  0x47   : > { %v1265_v36 = vld [vmem:[#allocation8 + $0x78] sm:$0xff]  ;;  %v1123_v37 = vor.u32 %v1238_v32, %v1120_v33  ;;  %v1236_v40 = vld [vmem:[#allocation5 + $0x14] sm:$0xf]  ;;  %698 = vmatpush.bf16.msra.mxu2 %v1257_v35  ;;  %v1235_v47 = vld [vmem:[#allocation5 + $0x4] sm:$0xf0]  ;;  %s1266_s18 = sshll.u32 %s1673_s9, 5 }
  0x48   : > { %v1237_v39 = vld [vmem:[#allocation5 + $0x14] sm:$0xf0]  ;;  %v1112_v41 = vld [vmem:[#allocation5 + $0x18] sm:$0xf0]  ;;  %717 = vmatpush.bf16.msra.mxu3 %v1265_v36  ;;  %v1102_v46 = vld [vmem:[#allocation5] sm:$0xf]  ;;  %s968_s22 = scalar_lea.hbm %s1906_s8, %s1266_s18 }
  0x49   : > { %518 = vmatpush.bf16.msra.mxu0 %v1143_v16  ;;  %v1256_v42 = vld [vmem:[#allocation8 + $0x30] sm:$0xff]  ;;  %v1111_v44 = vor.u32 %v1237_v39, %v1110_v38  ;;  %v1115_v45 = vor.u32 %v1236_v40, %v1112_v41  ;;  %v1234_v48 = vld [vmem:[#allocation5 + $0x4] sm:$0xf]  ;;  %v1104_v49 = vld [vmem:[#allocation5 + $0x8] sm:$0xf0]  ;;  %v1103_v52 = vor.u32 %v1235_v47, %v1102_v46  ;;  %s969_s19 = sshll.u32 %s1855_s14, 4  ;;  %s970_s19 = int_to_ptr.vmem [resolvable:$true] %s969_s19 }
  0x4a   : > { %537 = vmatpush.bf16.msra.mxu1 %v1147_v17  ;;  %v1264_v43 = vld [vmem:[#allocation8 + $0x70] sm:$0xff]  ;;  %v1255_v50 = vld [vmem:[#allocation8 + $0x28] sm:$0xff]  ;;  %v1796_v53 = vld [vmem:[%s1781_s23] sm:$0xff]  ;;  %v1107_v55 = vor.u32 %v1234_v48, %v1104_v49  ;;  %s971_s2 = sshll.u32 %s968_s22, 4  ;;  %s957_s9 = scalar_lea.sflag [#allocation4], %s1775_s26  ;;  %s972_s2 = int_to_ptr.hbm [resolvable:$true] %s971_s2 }
  0x4b   : > { %699 = vmatpush.bf16.msra.mxu2 %v1256_v42  ;;  %v1263_v51 = vld [vmem:[#allocation8 + $0x68] sm:$0xff]  ;;  %v1254_v56 = vld [vmem:[#allocation8 + $0x20] sm:$0xff]  ;;  %v1807_v60 = vld [vmem:[%s1781_s23 + $0x18] sm:$0xff]  ;;  %s1535_s3 = sshra.s32 %s972_s2, 4  ;;  %s1541_s16 = scalar_lea.hbm %s1906_s8, 64  ;;  %s1536_s3 = int_to_ptr.hbm [resolvable:$true] %s1535_s3 }
  0x4c   : > { %718 = vmatpush.bf16.msra.mxu3 %v1264_v43  ;;  %v1799_v54 = vld [vmem:[%s1781_s23 + $0x8] sm:$0xff]  ;;  %v1804_v59 = vld [vmem:[%s1781_s23 + $0x10] sm:$0xff]  ;;  %v1253_v62 = vld [vmem:[#allocation8 + $0x18] sm:$0xff]  ;;  %s1537_s23 = scalar_lea.hbm %s1536_s3, 32  ;;  %p1542_p11 = scmp.lt.s32.totalorder %s1536_s3, %s1906_s8 }
  0x4d   : > { %519 = vmatpush.bf16.msra.mxu0 %v1135_v22  ;;  %v1262_v57 = vld [vmem:[#allocation8 + $0x60] sm:$0xff]  ;;  %v412_v58 = vpack.c.bf16 %v1799_v54, %v1796_v53  ;;  %v413_v61 = vpack.c.bf16 %v1807_v60, %v1804_v59  ;;  %v1261_v63 = vld [vmem:[#allocation8 + $0x58] sm:$0xff]  ;;  %v1252_v0 = vld [vmem:[#allocation8 + $0x10] sm:$0xff]  ;;  %p1538_p1 = scmp.ne.s32.totalorder %s1536_s3, %s1537_s23  ;;  %p1543_p2 = scmp.lt.s32.totalorder %s1541_s16, %s1537_s23 }
  0x4e   : > { %538 = vmatpush.bf16.msra.mxu1 %v1139_v25  ;;  %v1260_v1 = vld [vmem:[#allocation8 + $0x50] sm:$0xff]  ;;  %v1251_v2 = vld [vmem:[#allocation8 + $0x8] sm:$0xff]  ;;  %v1250_v4 = vld [vmem:[#allocation8] sm:$0xff] }
  0x4f   : > { %700 = vmatpush.bf16.msra.mxu2 %v1255_v50  ;;  %v1259_v3 = vld [vmem:[#allocation8 + $0x48] sm:$0xff]  ;;  %v1258_v5 = vld [vmem:[#allocation8 + $0x40] sm:$0xff]  ;;  %v430_v6 = vld [vmem:[#allocation7] sm:$0x3]  ;;  %p1539_p4 = pnand %p1538_p1, %p1742_p3  ;;  %p1544_p9 = por %p1543_p2, %p1542_p11 }
  0x50   : > { %719 = vmatpush.bf16.msra.mxu3 %v1263_v51  ;;  %v411_v8 = vld [vmem:[#allocation10 + $0x78] sm:$0xff]  ;;  %v410_v9 = vld [vmem:[#allocation10 + $0x70] sm:$0xff]  ;;  %v409_v11 = vld [vmem:[#allocation10 + $0x68] sm:$0xff]  ;;  %v1811_v12 = vperm.slane %v430_v6, 0  ;;  %v1813_v13 = vperm.slane %v430_v6, 1 }
  0x51   : > { %520 = vmatpush.bf16.msra.mxu0 %v1127_v28  ;;  %v408_v14 = vld [vmem:[#allocation10 + $0x60] sm:$0xff]  ;;  %v407_v15 = vld [vmem:[#allocation10 + $0x58] sm:$0xff]  ;;  %v406_v19 = vld [vmem:[#allocation10 + $0x50] sm:$0xff]  ;;  %p1540_p8 = pneg %p1539_p4 }
  0x52   : > { %539 = vmatpush.bf16.msra.mxu1 %v1131_v29  ;;  %v405_v23 = vld [vmem:[#allocation10 + $0x48] sm:$0xff]  ;;  %v404_v28 = vld [vmem:[#allocation10 + $0x40] sm:$0xff]  ;;  %v403_v31 = vld [vmem:[#allocation10 + $0x38] sm:$0xff] }
  0x53   : > { %701 = vmatpush.bf16.msra.mxu2 %v1254_v56  ;;  %v402_v33 = vld [vmem:[#allocation10 + $0x30] sm:$0xff]  ;;  %v401_v47 = vld [vmem:[#allocation10 + $0x28] sm:$0xff]  ;;  %v400_v48 = vld [vmem:[#allocation10 + $0x20] sm:$0xff]  ;;  %p1545_p10 = pnand %p1544_p9, %p1540_p8 }
  0x54   : > { %720 = vmatpush.bf16.msra.mxu3 %v1262_v57  ;;  %v399_v49 = vld [vmem:[#allocation10 + $0x18] sm:$0xff]  ;;  %v398_v50 = vld [vmem:[#allocation10 + $0x10] sm:$0xff]  ;;  %v397_v51 = vld [vmem:[#allocation10 + $0x8] sm:$0xff] }
  0x55   : > { %521 = vmatpush.bf16.msra.mxu0 %v1119_v34 }
  0x56   : > { %540 = vmatpush.bf16.msra.mxu1 %v1123_v37 }
  0x57   : > { %702 = vmatpush.bf16.msra.mxu2 %v1253_v62 }
  0x58   : > { %721 = vmatpush.bf16.msra.mxu3 %v1261_v63 }
  0x59   : > { %522 = vmatpush.bf16.msra.mxu0 %v1111_v44 }
  0x5a   : > { %541 = vmatpush.bf16.msra.mxu1 %v1115_v45 }
  0x5b   : > { %703 = vmatpush.bf16.msra.mxu2 %v1252_v0 }
  0x5c   : > { %722 = vmatpush.bf16.msra.mxu3 %v1260_v1 }
  0x5d   : > { %523 = vmatpush.bf16.msra.mxu0 %v1103_v52  ;;  %v396_v52 = vld [vmem:[#allocation10] sm:$0xff] }
  0x5e   : > { %542 = vmatpush.bf16.msra.mxu1 %v1107_v55  ;;  %v1360_v55 = vld [vmem:[%s1902_s4] ss:$0 sm:$0xff] }
  0x5f   : > { %704 = vmatpush.bf16.msra.mxu2 %v1251_v2 }
  0x60   : > { %524 = vmatmul.bf16.vlgmr.msra.gmra.mxu0 %v412_v58  ;;  %723 = vmatpush.bf16.msra.mxu3 %v1259_v3 }
  0x61   : > { %543 = vmatmul.bf16.vlgmr.msra.gmra.mxu1 %v412_v58  ;;  %752 = vmatpush.msrb.mxu0 %v411_v8 }
  0x62   : > { %781 = vmatpush.msrb.mxu1 %v411_v8 }
  0x63   : > { %705 = vmatpush.bf16.msra.mxu2 %v1250_v4  ;;  %753 = vmatpush.msrb.mxu0 %v410_v9 }
  0x64   : > { %724 = vmatpush.bf16.msra.mxu3 %v1258_v5  ;;  %782 = vmatpush.msrb.mxu1 %v410_v9 }
  0x65   : > { %754 = vmatpush.msrb.mxu0 %v409_v11 }
  0x66   : > { %783 = vmatpush.msrb.mxu1 %v409_v11 }
  0x67   : > { %830 = vmatpush.msrb.mxu2 %v411_v8  ;;  %755 = vmatpush.msrb.mxu0 %v408_v14 }
  0x68   : > { %859 = vmatpush.msrb.mxu3 %v411_v8  ;;  %784 = vmatpush.msrb.mxu1 %v408_v14 }
  0x69   : > { %831 = vmatpush.msrb.mxu2 %v410_v9  ;;  %756 = vmatpush.msrb.mxu0 %v407_v15 }
  0x6a   : > { %860 = vmatpush.msrb.mxu3 %v410_v9  ;;  %785 = vmatpush.msrb.mxu1 %v407_v15 }
  0x6b   : > { %832 = vmatpush.msrb.mxu2 %v409_v11  ;;  %757 = vmatpush.msrb.mxu0 %v406_v19 }
  0x6c   : > { %861 = vmatpush.msrb.mxu3 %v409_v11  ;;  %786 = vmatpush.msrb.mxu1 %v406_v19 }
  0x6d   : > { %833 = vmatpush.msrb.mxu2 %v408_v14  ;;  %758 = vmatpush.msrb.mxu0 %v405_v23 }
  0x6e   : > { %862 = vmatpush.msrb.mxu3 %v408_v14  ;;  %787 = vmatpush.msrb.mxu1 %v405_v23 }
  0x6f   : > { %834 = vmatpush.msrb.mxu2 %v407_v15  ;;  %759 = vmatpush.msrb.mxu0 %v404_v28 }
  0x70   : > { %529 = vmatmul.bf16.gmra.mxu0 %v413_v61  ;;  %863 = vmatpush.msrb.mxu3 %v407_v15 }
  0x71   : > { %548 = vmatmul.bf16.gmra.mxu1 %v413_v61  ;;  %835 = vmatpush.msrb.mxu2 %v406_v19 }
  0x72   : > { %864 = vmatpush.msrb.mxu3 %v406_v19  ;;  %788 = vmatpush.msrb.mxu1 %v404_v28 }
  0x73   : > { %836 = vmatpush.msrb.mxu2 %v405_v23  ;;  %760 = vmatpush.msrb.mxu0 %v403_v31 }
  0x74   : > { %865 = vmatpush.msrb.mxu3 %v405_v23  ;;  %789 = vmatpush.msrb.mxu1 %v403_v31 }
  0x75   : > { %837 = vmatpush.msrb.mxu2 %v404_v28  ;;  %761 = vmatpush.msrb.mxu0 %v402_v33 }
  0x76   : > { %866 = vmatpush.msrb.mxu3 %v404_v28  ;;  %790 = vmatpush.msrb.mxu1 %v402_v33 }
  0x77   : > { %838 = vmatpush.msrb.mxu2 %v403_v31  ;;  %762 = vmatpush.msrb.mxu0 %v401_v47 }
  0x78   : > { %867 = vmatpush.msrb.mxu3 %v403_v31  ;;  %791 = vmatpush.msrb.mxu1 %v401_v47 }
  0x79   : > { %839 = vmatpush.msrb.mxu2 %v402_v33  ;;  %763 = vmatpush.msrb.mxu0 %v400_v48 }
  0x7a   : > { %868 = vmatpush.msrb.mxu3 %v402_v33  ;;  %792 = vmatpush.msrb.mxu1 %v400_v48 }
  0x7b   : > { %840 = vmatpush.msrb.mxu2 %v401_v47  ;;  %764 = vmatpush.msrb.mxu0 %v399_v49 }
  0x7c   : > { %869 = vmatpush.msrb.mxu3 %v401_v47  ;;  %793 = vmatpush.msrb.mxu1 %v399_v49 }
  0x7d   : > { %841 = vmatpush.msrb.mxu2 %v400_v48  ;;  %765 = vmatpush.msrb.mxu0 %v398_v50 }
  0x7e   : > { %870 = vmatpush.msrb.mxu3 %v400_v48  ;;  %794 = vmatpush.msrb.mxu1 %v398_v50 }
  0x7f   : > { %842 = vmatpush.msrb.mxu2 %v399_v49  ;;  %766 = vmatpush.msrb.mxu0 %v397_v51 }
  0x80   : > { %871 = vmatpush.msrb.mxu3 %v399_v49  ;;  %795 = vmatpush.msrb.mxu1 %v397_v51 }
  0x81   : > { %843 = vmatpush.msrb.mxu2 %v398_v50  ;;  %767 = vmatpush.msrb.mxu0 %v396_v52 }
  0x82   : > { %872 = vmatpush.msrb.mxu3 %v398_v50  ;;  %796 = vmatpush.msrb.mxu1 %v396_v52 }
  0x83   : > { %844 = vmatpush.msrb.mxu2 %v397_v51 }
  0x84   : > { %873 = vmatpush.msrb.mxu3 %v397_v51 }
  0x85   : > { %845 = vmatpush.msrb.mxu2 %v396_v52 }
  0x86   : > { %874 = vmatpush.msrb.mxu3 %v396_v52 }
  0xdd   : > { %v525_v7 = vpop.f32.mrf.mxu0 }
  0xde   : > { %v544_v10 = vpop.f32.mrf.mxu1  ;;  %v526_v16 = vadd.f32 %v525_v7, %v1811_v12 }
  0xdf   : > { %v545_v17 = vadd.f32 %v544_v10, %v1813_v13 }
  0xe0   : > { %v554_v24 = vmax.f32 %v526_v16, 0.0 }
  0xe1   : > { %v555_v26 = vmax.f32 %v545_v17, 0.0 }
  0xe5   : > { %v527_v18 = vpop.f32.mrf.mxu0 }
  0xe6   : > { %v528_v20 = vadd.f32 %v527_v18, %v1811_v12  ;;  %v546_v21 = vpop.f32.mrf.mxu1 }
  0xe7   : > { %v547_v22 = vadd.f32 %v546_v21, %v1813_v13 }
  0xe8   : > { %v556_v25 = vmax.f32 %v528_v20, 0.0 }
  0xe9   : > { %v557_v27 = vmax.f32 %v547_v22, 0.0 }
  0xea   : > { %v562_v29 = vpack.c.bf16 %v556_v25, %v554_v24 }
  0xeb   : > { %v563_v30 = vpack.c.bf16 %v557_v27, %v555_v26 }
  0xec   : > { %706 = vmatmul.bf16.vlgmr.msra.gmra.mxu2 %v562_v29 }
  0xed   : > { %725 = vmatmul.bf16.vlgmr.msra.gmra.mxu3 %v563_v30  ;;  %v530_v32 = vpop.f32.mrf.mxu0 }
  0xee   : > { %v549_v34 = vpop.f32.mrf.mxu1  ;;  %v531_v35 = vadd.f32 %v530_v32, %v1811_v12 }
  0xef   : > { %v550_v36 = vadd.f32 %v549_v34, %v1813_v13 }
  0xf0   : > { %v558_v41 = vmax.f32 %v531_v35, 0.0 }
  0xf1   : > { %v559_v43 = vmax.f32 %v550_v36, 0.0 }
  0xf5   : > { %v532_v37 = vpop.f32.mrf.mxu0 }
  0xf6   : > { %v533_v38 = vadd.f32 %v532_v37, %v1811_v12  ;;  %v551_v39 = vpop.f32.mrf.mxu1 }
  0xf7   : > { %v552_v40 = vadd.f32 %v551_v39, %v1813_v13 }
  0xf8   : > { %v560_v42 = vmax.f32 %v533_v38, 0.0 }
  0xf9   : > { %v561_v44 = vmax.f32 %v552_v40, 0.0 }
  0xfa   : > { %v564_v45 = vpack.c.bf16 %v560_v42, %v558_v41 }
  0xfb   : > { %v565_v46 = vpack.c.bf16 %v561_v44, %v559_v43 }
  0xfc   : > { %711 = vmatmul.bf16.gmra.mxu2 %v564_v45 }
  0xfd   : > { %730 = vmatmul.bf16.gmra.mxu3 %v565_v46 }
 0x16f   : > { %v707_v56 = vpop.f32.mrf.mxu2 }
 0x170   : > { %v708_v57 = vadd.f32 %v1360_v55, %v707_v56  ;;  %v726_v58 = vpop.f32.mrf.mxu3 }
 0x172   : > { %v727_v61 = vadd.f32 %v726_v58, %v708_v57 }
 0x174   : > { %v736_v62 = vadd.f32 %v727_v61, %v1796_v53 }
 0x176   : > { %v740_v63 = vpack.c.bf16 %v736_v62, %v736_v62 }
 0x177   : > { %v709_v0 = vpop.f32.mrf.mxu2 }
 0x178   : > { %v710_v1 = vadd.f32 %v1360_v55, %v709_v0  ;;  %v728_v2 = vpop.f32.mrf.mxu3  ;;  %v744_v3 = vunpack.c.l.bf16 %v740_v63 }
 0x17a   : > { %v729_v4 = vadd.f32 %v728_v2, %v710_v1  ;;  %797 = vmatmul.f32.vlgmr.msrb.gmra.mxu1 %v744_v3  ;;  %v748_v5 = vsub.f32 %v736_v62, %v744_v3 }
 0x17c   : > { %v737_v6 = vadd.f32 %v729_v4, %v1799_v54  ;;  %768 = vmatmul.f32.vlgmr.msrb.gmra.mxu0 %v748_v5 }
 0x17e   : > { %v741_v7 = vpack.c.bf16 %v737_v6, %v737_v6 }
 0x17f   : > { %v712_v8 = vpop.f32.mrf.mxu2 }
 0x180   : > { %v713_v9 = vadd.f32 %v1360_v55, %v712_v8  ;;  %v731_v10 = vpop.f32.mrf.mxu3  ;;  %v745_v11 = vunpack.c.l.bf16 %v741_v7 }
 0x182   : > { %v732_v12 = vadd.f32 %v731_v10, %v713_v9  ;;  %800 = vmatmul.f32.gmra.mxu1 %v745_v11  ;;  %v749_v13 = vsub.f32 %v737_v6, %v745_v11 }
 0x184   : > { %v738_v53 = vadd.f32 %v732_v12, %v1804_v59  ;;  %771 = vmatmul.f32.gmra.mxu0 %v749_v13 }
 0x186   : > { %v742_v14 = vpack.c.bf16 %v738_v53, %v738_v53 }
 0x187   : > { %v714_v15 = vpop.f32.mrf.mxu2 }
 0x188   : > { %v715_v16 = vadd.f32 %v1360_v55, %v714_v15  ;;  %v746_v17 = vunpack.c.l.bf16 %v742_v14  ;;  %v733_v18 = vpop.f32.mrf.mxu3 }
 0x18a   : > { %v734_v19 = vadd.f32 %v733_v18, %v715_v16  ;;  %803 = vmatmul.f32.gmra.mxu1 %v746_v17  ;;  %v750_v54 = vsub.f32 %v738_v53, %v746_v17  ;;  %v1362_v17 = vld [vmem:[%s1904_s6] ss:$0 sm:$0xff] }
 0x18c   : > { %v739_v20 = vadd.f32 %v734_v19, %v1807_v60  ;;  %774 = vmatmul.f32.gmra.mxu0 %v750_v54 }
 0x18e   : > { %v743_v21 = vpack.c.bf16 %v739_v20, %v739_v20 }
 0x190   : > { %v747_v22 = vunpack.c.l.bf16 %v743_v21 }
 0x192   : > { %806 = vmatmul.f32.gmra.mxu1 %v747_v22  ;;  %v751_v23 = vsub.f32 %v739_v20, %v747_v22 }
 0x194   : > { %777 = vmatmul.f32.gmra.mxu0 %v751_v23 }
 0x1f7   : > { %v798_v24 = vpop.f32.mrf.mxu1 }
 0x1f9   : > { %v769_v25 = vpop.f32.mrf.mxu0 }
 0x1fa   : > { %v799_v59 = vadd.f32 %v798_v24, %v769_v25 }
 0x1fc   : > { %v1830_v26 = vsub.f32 %v736_v62, %v799_v59 }
 0x1fe   : > { %v814_v27 = vmul.f32 %v1830_v26, %v1830_v26 }
 0x1ff   : > { %v801_v28 = vpop.f32.mrf.mxu1 }
 0x200   : > { %v818_v29 = vpack.c.bf16 %v814_v27, %v814_v27 }
 0x201   : > { %v772_v30 = vpop.f32.mrf.mxu0 }
 0x202   : > { %v802_v31 = vadd.f32 %v801_v28, %v772_v30  ;;  %v822_v32 = vunpack.c.l.bf16 %v818_v29 }
 0x204   : > { %v1834_v60 = vsub.f32 %v737_v6, %v802_v31  ;;  %875 = vmatmul.f32.vlgmr.msrb.gmra.mxu3 %v822_v32  ;;  %v826_v33 = vsub.f32 %v814_v27, %v822_v32 }
 0x206   : > { %846 = vmatmul.f32.vlgmr.msrb.gmra.mxu2 %v826_v33  ;;  %v815_v34 = vmul.f32 %v1834_v60, %v1834_v60 }
 0x207   : > { %v804_v35 = vpop.f32.mrf.mxu1 }
 0x208   : > { %v819_v36 = vpack.c.bf16 %v815_v34, %v815_v34 }
 0x209   : > { %v775_v37 = vpop.f32.mrf.mxu0 }
 0x20a   : > { %v805_v38 = vadd.f32 %v804_v35, %v775_v37  ;;  %v823_v39 = vunpack.c.l.bf16 %v819_v36 }
 0x20c   : > { %v1838_v40 = vsub.f32 %v738_v53, %v805_v38  ;;  %878 = vmatmul.f32.gmra.mxu3 %v823_v39  ;;  %v827_v41 = vsub.f32 %v815_v34, %v823_v39  ;;  %v1361_v53 = vld [vmem:[%s1903_s5] ss:$0 sm:$0xff] }
 0x20e   : > { %849 = vmatmul.f32.gmra.mxu2 %v827_v41  ;;  %v816_v42 = vmul.f32 %v1838_v40, %v1838_v40 }
 0x20f   : > { %v807_v44 = vpop.f32.mrf.mxu1 }
 0x210   : > { %v820_v43 = vpack.c.bf16 %v816_v42, %v816_v42 }
 0x211   : > { %v778_v45 = vpop.f32.mrf.mxu0 }
 0x212   : > { %v808_v46 = vadd.f32 %v807_v44, %v778_v45  ;;  %v824_v47 = vunpack.c.l.bf16 %v820_v43 }
 0x214   : > { %v1842_v48 = vsub.f32 %v739_v20, %v808_v46  ;;  %881 = vmatmul.f32.gmra.mxu3 %v824_v47  ;;  %v828_v49 = vsub.f32 %v816_v42, %v824_v47 }
 0x216   : > { %852 = vmatmul.f32.gmra.mxu2 %v828_v49  ;;  %v817_v50 = vmul.f32 %v1842_v48, %v1842_v48 }
 0x218   : > { %v821_v51 = vpack.c.bf16 %v817_v50, %v817_v50 }
 0x21a   : > { %v825_v52 = vunpack.c.l.bf16 %v821_v51 }
 0x21c   : > { %884 = vmatmul.f32.gmra.mxu3 %v825_v52  ;;  %v829_v55 = vsub.f32 %v817_v50, %v825_v52 }
 0x21e   : > { %855 = vmatmul.f32.gmra.mxu2 %v829_v55 }
 0x287   : > { %v876_v56 = vpop.f32.mrf.mxu3 }
 0x289   : > { %v847_v57 = vpop.f32.mrf.mxu2 }
 0x28a   : > { %v877_v58 = vadd.f32 %v876_v56, %v847_v57 }
 0x28c   : > { %v888_v61 = vadd.f32 1e-05, %v877_v58 }
 0x28e   : > { %1363 = vrsqrt.f32 %v888_v61  ;;  %vm898_vm1 = vweird.f32 %v888_v61 }
 0x28f   : > { %v879_v62 = vpop.f32.mrf.mxu3 }
 0x291   : > { %v850_v63 = vpop.f32.mrf.mxu2 }
 0x292   : > { %v880_v0 = vadd.f32 %v879_v62, %v850_v63 }
 0x294   : > { %v1364_v1 = vpop.eup %1363  ;;  %v889_v2 = vadd.f32 1e-05, %v880_v0 }
 0x295   : > { %v893_v3 = vmul.f32 %v1364_v1, %v888_v61  ;;  %vm899_vm0 = vweird.f32 %v1364_v1 }
 0x296   : > { %1365 = vrsqrt.f32 %v889_v2  ;;  %vm900_vm2 = vmor %vm898_vm1, %vm899_vm0  ;;  %vm908_vm4 = vweird.f32 %v889_v2 }
 0x297   : > { %v894_v4 = vmul.f32 %v1364_v1, %v893_v3  ;;  %v882_v5 = vpop.f32.mrf.mxu3 }
 0x299   : > { %v895_v6 = vmul.f32 0.5, %v894_v4  ;;  %v853_v7 = vpop.f32.mrf.mxu2 }
 0x29a   : > { %v883_v8 = vadd.f32 %v882_v5, %v853_v7 }
 0x29b   : > { %v896_v9 = vsub.f32 1.5, %v895_v6 }
 0x29c   : > { %v1366_v10 = vpop.eup %1365  ;;  %v890_v11 = vadd.f32 1e-05, %v883_v8 }
 0x29d   : > { %v897_v12 = vmul.f32 %v1364_v1, %v896_v9  ;;  %v903_v13 = vmul.f32 %v1366_v10, %v889_v2  ;;  %vm909_vm3 = vweird.f32 %v1366_v10 }
 0x29e   : > { %1367 = vrsqrt.f32 %v890_v11  ;;  %vm910_vm5 = vmor %vm908_vm4, %vm909_vm3  ;;  %vm918_vm7 = vweird.f32 %v890_v11 }
 0x29f   : > { %v901_v14 = vsel %vm900_vm2, %v1364_v1, %v897_v12  ;;  %v904_v15 = vmul.f32 %v1366_v10, %v903_v13  ;;  %v885_v19 = vpop.f32.mrf.mxu3 }
 0x2a0   : > { %v932_v16 = vmul.f32 %v901_v14, %v1830_v26 }
 0x2a1   : > { %v905_v18 = vmul.f32 0.5, %v904_v15  ;;  %v856_v54 = vpop.f32.mrf.mxu2 }
 0x2a2   : > { %v940_v20 = vmul.f32 %v1361_v53, %v932_v16  ;;  %v886_v21 = vadd.f32 %v885_v19, %v856_v54 }
 0x2a3   : > { %v906_v22 = vsub.f32 1.5, %v905_v18 }
 0x2a4   : > { %v1368_v23 = vpop.eup %1367  ;;  %v948_v24 = vadd.f32 %v1362_v17, %v940_v20  ;;  %v891_v25 = vadd.f32 1e-05, %v886_v21 }
 0x2a5   : > { %v907_v59 = vmul.f32 %v1366_v10, %v906_v22  ;;  %v913_v27 = vmul.f32 %v1368_v23, %v890_v11  ;;  %vm919_vm6 = vweird.f32 %v1368_v23 }
 0x2a6   : > { %952 = vst [vmem:[%s1855_s14] sm:$0xff] %v948_v24  ;;  %1369 = vrsqrt.f32 %v891_v25  ;;  %vm920_vm8 = vmor %vm918_vm7, %vm919_vm6  ;;  %vm928_vm10 = vweird.f32 %v891_v25 }
 0x2a7   : > { %v911_v26 = vsel %vm910_vm5, %v1366_v10, %v907_v59  ;;  %v914_v28 = vmul.f32 %v1368_v23, %v913_v27 }
 0x2a8   : > { %v933_v29 = vmul.f32 %v911_v26, %v1834_v60 }
 0x2a9   : > { %v915_v30 = vmul.f32 0.5, %v914_v28 }
 0x2aa   : > { %v941_v31 = vmul.f32 %v1361_v53, %v933_v29 }
 0x2ab   : > { %v916_v32 = vsub.f32 1.5, %v915_v30 }
 0x2ac   : > { %v1370_v33 = vpop.eup %1369  ;;  %v949_v34 = vadd.f32 %v1362_v17, %v941_v31 }
 0x2ad   : > { %v917_v35 = vmul.f32 %v1368_v23, %v916_v32  ;;  %v923_v36 = vmul.f32 %v1370_v33, %v891_v25  ;;  %vm929_vm9 = vweird.f32 %v1370_v33 }
 0x2ae   : > { %953 = vst [vmem:[%s1855_s14 + $0x8] sm:$0xff] %v949_v34  ;;  %vm930_vm11 = vmor %vm928_vm10, %vm929_vm9 }
 0x2af   : > { %v921_v37 = vsel %vm920_vm8, %v1368_v23, %v917_v35  ;;  %v924_v38 = vmul.f32 %v1370_v33, %v923_v36 }
 0x2b0   : > { %v934_v39 = vmul.f32 %v921_v37, %v1838_v40 }
 0x2b1   : > { %v925_v41 = vmul.f32 0.5, %v924_v38 }
 0x2b2   : > { %v942_v60 = vmul.f32 %v1361_v53, %v934_v39 }
 0x2b3   : > { %v926_v42 = vsub.f32 1.5, %v925_v41 }
 0x2b4   : > { %v950_v43 = vadd.f32 %v1362_v17, %v942_v60 }
 0x2b5   : > { %v927_v44 = vmul.f32 %v1370_v33, %v926_v42 }
 0x2b6   : > { %954 = vst [vmem:[%s1855_s14 + $0x10] sm:$0xff] %v950_v43 }
 0x2b7   : > { %v931_v45 = vsel %vm930_vm11, %v1370_v33, %v927_v44 }
 0x2b8   : > { %v935_v40 = vmul.f32 %v931_v45, %v1842_v48 }
 0x2ba   : > { %v943_v46 = vmul.f32 %v1361_v53, %v935_v40 }
 0x2bc   : > { %v951_v47 = vadd.f32 %v1362_v17, %v943_v46 }
 0x2be   : > { %955 = vst [vmem:[%s1855_s14 + $0x18] sm:$0xff] %v951_v47 }
 0x2bf   : > { %1548 = shalt.err (!%p1545_p10)
}
 0x2c0   : > { %s1605_s26 = smov 128   ;;  %s1606_s17 = smov 8  }
 0x2c1   : > { %1285 = dma.vmem_to_hbm [thread:$0]  (%p1742_p3), %s970_s19, 512, %s972_s2, %s957_s9, %s1605_s26, %s1605_s26, %s1606_s17  }
 0x2c2 PF: > { %s986_s14 = sand.u32 1, %s1583_s27   ;;  %p1924_p12 = scmp.ge.s32.totalorder %s1595_s30, 2 }
 0x2c3   : > { %s987_s18 = scalar_lea.sflag [#allocation4], %s986_s14 }
 0x2c4   : > { %p1305_p13 = pnand %p1924_p12, %p1687_p6 }
 0x2c6   : > { %p1306_p0 = pneg %p1305_p13 }
 0x2c8   : > { %1578 = dma.done.wait (%p1306_p0), %s987_s18, 512  }
 0x2c9   : > { %1580 = vsyncadd (%p1306_p0), %s987_s18, 4294966784  ;;  %p23_p5 = scmp.ge.s32.totalorder %s1732_s13, 4   ;;  %s1925_s27 = smov %s1587_s28 }
 0x2ca   : > { %s1926_s28 = smov %s1591_s29  ;;  %s1927_s29 = smov %s1748_s15 }
 0x2cb   : > { %s1928_s30 = smov %s1732_s13  ;;  %25 = sbr.rel (!%p23_p5) target bundleno = 11 (0xb), region = 113 }
 0x2d0   :  { %993 = vsyncpa [#allocation3], 1 }
 0x2d1   :  { %995 = vsyncpa [#allocation3 + $0x1], 1 }
 0x2d2   :  { %996 = vsyncpa [#allocation6], 1 }
 0x2d3   :  { %997 = vsyncpa [#allocation9], 1 }
 0x2d4   :  { %998 = vsyncpa [#allocation4], 1 }
 0x2d5   :  { %1000 = vsyncpa [#allocation4 + $0x1], 1 }

</bundles_post_ra>
